<compile_context>
chip_gen: v6e
topology: v6e:2x2x1
jax: 0.10.0
libtpu: 0.0.40
codegen_flags: <defaults>
</compile_context>

<pallas_src>
import jax
import jax.numpy as jnp
from jax.experimental import pallas as pl
from jax.experimental.pallas import tpu as pltpu


def _gmm_kernel(x_ref, wm_ref, bm_ref, wc_ref, bc_ref, wp_ref, bp_ref,
                means_ref, covs_ref, priors_ref):
    # x_ref:      (TB, Din)     batch tile of the base-module output
    # wm_ref:     (Din, K*D)    stacked mean heads          bm_ref: (1, K*D)
    # wc_ref:     (Din, K*D)    stacked log-variance heads  bc_ref: (1, K*D)
    # wp_ref:     (Din, K)      prior-logit head            bp_ref: (1, K)
    # means_ref:  (TB, K*D)     output: component means (lane-dense)
    # covs_ref:   (TB, K*D)     output: diagonal covariances (lane-dense)
    # priors_ref: (TB, K)       output: mixture weights (softmax over K)
    x = x_ref[...].astype(jnp.float32)

    # K mean heads as one lane-dense MXU matmul.
    means = jnp.dot(x, wm_ref[...], preferred_element_type=jnp.float32) + bm_ref[...]
    means_ref[...] = means.astype(means_ref.dtype)

    # K diagonal-covariance heads: linear -> exp (EUP) guarantees positive variances.
    logvar = jnp.dot(x, wc_ref[...], preferred_element_type=jnp.float32) + bc_ref[...]
    covs_ref[...] = jnp.exp(logvar).astype(covs_ref.dtype)

    # Prior head: linear -> numerically-stable softmax over the K components.
    logits = jnp.dot(x, wp_ref[...], preferred_element_type=jnp.float32) + bp_ref[...]
    m = jnp.max(logits, axis=-1, keepdims=True)
    e = jnp.exp(logits - m)
    priors = e / jnp.sum(e, axis=-1, keepdims=True)
    priors_ref[...] = priors.astype(priors_ref.dtype)


def gaussian_mixture_forward(x, w_mean, b_mean, w_logvar, b_logvar,
                             w_prior, b_prior, *, block_b=512,
                             vmem_limit_bytes=None):
    """Fused GMM parameter head: returns (priors [B,K], means [B,K,D], covs [B,K,D])."""
    B, Din = x.shape
    KD = w_mean.shape[1]
    K = w_prior.shape[1]
    assert KD % K == 0
    D = KD // K
    assert w_logvar.shape == (Din, KD)
    assert b_mean.shape == (1, KD) and b_logvar.shape == (1, KD)
    assert b_prior.shape == (1, K)

    # Batch tile: big enough to amortize per-step overhead, small enough to keep
    # double-buffered tiles well inside VMEM (v7x has only 64 MiB per TC).
    if B <= block_b:
        tb = B
    else:
        tb = block_b  # multiple of 8 by construction

    grid = (pl.cdiv(B, tb),)

    means, covs, priors = pl.pallas_call(
        _gmm_kernel,
        out_shape=(
            jax.ShapeDtypeStruct((B, KD), x.dtype),   # means (stacked over K)
            jax.ShapeDtypeStruct((B, KD), x.dtype),   # diagonal covariances
            jax.ShapeDtypeStruct((B, K), x.dtype),    # mixture priors
        ),
        grid_spec=pltpu.PrefetchScalarGridSpec(
            num_scalar_prefetch=0,
            grid=grid,
            in_specs=[
                pl.BlockSpec((tb, Din), lambda i: (i, 0)),   # x: batch-tiled
                pl.BlockSpec((Din, KD), lambda i: (0, 0)),   # weights stay resident
                pl.BlockSpec((1, KD), lambda i: (0, 0)),
                pl.BlockSpec((Din, KD), lambda i: (0, 0)),
                pl.BlockSpec((1, KD), lambda i: (0, 0)),
                pl.BlockSpec((Din, K), lambda i: (0, 0)),
                pl.BlockSpec((1, K), lambda i: (0, 0)),
            ],
            out_specs=[
                pl.BlockSpec((tb, KD), lambda i: (i, 0)),
                pl.BlockSpec((tb, KD), lambda i: (i, 0)),
                pl.BlockSpec((tb, K), lambda i: (i, 0)),
            ],
        ),
        compiler_params=pltpu.CompilerParams(
            dimension_semantics=("parallel",),        # shard batch tiles across TCs (v7x)
            vmem_limit_bytes=vmem_limit_bytes,
        ),
    )(x, w_mean, b_mean, w_logvar, b_logvar, w_prior, b_prior)

    return priors, means.reshape(B, K, D), covs.reshape(B, K, D)


if __name__ == "__main__":
    key = jax.random.PRNGKey(0)
    ks = jax.random.split(key, 7)

    # Small shapes consistent with the module: batch=8, base features=32,
    # K=2 Gaussian components of dimension D=8.
    B, Din, D, K = 8, 32, 8, 2

    x = jax.random.normal(ks[0], (B, Din), dtype=jnp.float32)
    w_mean = 0.1 * jax.random.normal(ks[1], (Din, K * D), dtype=jnp.float32)
    b_mean = 0.1 * jax.random.normal(ks[2], (1, K * D), dtype=jnp.float32)
    w_logvar = 0.1 * jax.random.normal(ks[3], (Din, K * D), dtype=jnp.float32)
    b_logvar = 0.1 * jax.random.normal(ks[4], (1, K * D), dtype=jnp.float32)
    w_prior = 0.1 * jax.random.normal(ks[5], (Din, K), dtype=jnp.float32)
    b_prior = 0.1 * jax.random.normal(ks[6], (1, K), dtype=jnp.float32)

    priors, means, covs = gaussian_mixture_forward(
        x, w_mean, b_mean, w_logvar, b_logvar, w_prior, b_prior)
    jax.block_until_ready((priors, means, covs))

    # Plain-JAX reference of the same forward pass.
    ref_means = (x @ w_mean + b_mean).reshape(B, K, D)
    ref_covs = jnp.exp(x @ w_logvar + b_logvar).reshape(B, K, D)
    ref_logits = x @ w_prior + b_prior
    ref_priors = jax.nn.softmax(ref_logits, axis=-1)

    assert jnp.allclose(means, ref_means, atol=1e-5)
    assert jnp.allclose(covs, ref_covs, atol=1e-5)
    assert jnp.allclose(priors, ref_priors, atol=1e-5)
    assert jnp.allclose(jnp.sum(priors, axis=-1), 1.0, atol=1e-5)

    print("KERNEL_OK")
</pallas_src>

<mosaic_0001>
module attributes {stable_mosaic.version = 11 : i64} {
  func.func @_gmm_kernel(%arg0: i32, %arg1: memref<8x32xf32, #tpu.memory_space<vmem>>, %arg2: memref<32x16xf32, #tpu.memory_space<vmem>>, %arg3: memref<1x16xf32, #tpu.memory_space<vmem>>, %arg4: memref<32x16xf32, #tpu.memory_space<vmem>>, %arg5: memref<1x16xf32, #tpu.memory_space<vmem>>, %arg6: memref<32x2xf32, #tpu.memory_space<vmem>>, %arg7: memref<1x2xf32, #tpu.memory_space<vmem>>, %arg8: memref<8x16xf32, #tpu.memory_space<vmem>>, %arg9: memref<8x16xf32, #tpu.memory_space<vmem>>, %arg10: memref<8x2xf32, #tpu.memory_space<vmem>>) attributes {dimension_semantics = [#tpu.dimension_semantics<parallel>], iteration_bounds = array<i64: 1>, scalar_prefetch = 0 : i64, scratch_operands = 0 : i64, tpu.core_type = #tpu.core_type<tc>, window_params = [{transform_indices = @transform_0, window_bounds = array<i64: 8, 32>}, {pipeline_mode = #tpu.pipeline_mode<synchronous>, transform_indices = @transform_1, window_bounds = array<i64: 32, 16>}, {pipeline_mode = #tpu.pipeline_mode<synchronous>, transform_indices = @transform_2, window_bounds = array<i64: 1, 16>}, {pipeline_mode = #tpu.pipeline_mode<synchronous>, transform_indices = @transform_3, window_bounds = array<i64: 32, 16>}, {pipeline_mode = #tpu.pipeline_mode<synchronous>, transform_indices = @transform_4, window_bounds = array<i64: 1, 16>}, {pipeline_mode = #tpu.pipeline_mode<synchronous>, transform_indices = @transform_5, window_bounds = array<i64: 32, 2>}, {pipeline_mode = #tpu.pipeline_mode<synchronous>, transform_indices = @transform_6, window_bounds = array<i64: 1, 2>}, {transform_indices = @transform_7, window_bounds = array<i64: 8, 16>}, {transform_indices = @transform_8, window_bounds = array<i64: 8, 16>}, {transform_indices = @transform_9, window_bounds = array<i64: 8, 2>}]} {
    %c0 = arith.constant 0 : index
    %c0_0 = arith.constant 0 : index
    %0 = vector.load %arg1[%c0, %c0_0] : memref<8x32xf32, #tpu.memory_space<vmem>>, vector<8x32xf32>
    %c0_1 = arith.constant 0 : index
    %c0_2 = arith.constant 0 : index
    %1 = vector.load %arg2[%c0_1, %c0_2] : memref<32x16xf32, #tpu.memory_space<vmem>>, vector<32x16xf32>
    %cst = arith.constant dense<0.000000e+00> : vector<8x16xf32>
    %2 = tpu.matmul %0, %1, %cst {dimension_numbers = #tpu.dot_dimension_numbers<[1], [0], [0], [1], [0, 0, 1, 1], [], []>} : vector<8x32xf32>, vector<32x16xf32>, vector<8x16xf32> -> vector<8x16xf32>
    %c0_3 = arith.constant 0 : index
    %c0_4 = arith.constant 0 : index
    %3 = vector.load %arg3[%c0_3, %c0_4] : memref<1x16xf32, #tpu.memory_space<vmem>>, vector<1x16xf32>
    %4 = vector.broadcast %3 : vector<1x16xf32> to vector<8x16xf32>
    %5 = arith.addf %2, %4 : vector<8x16xf32>
    %c0_5 = arith.constant 0 : index
    %c0_6 = arith.constant 0 : index
    %6 = vector.load %arg8[%c0_5, %c0_6] : memref<8x16xf32, #tpu.memory_space<vmem>>, vector<8x16xf32>
    tpu.vector_store %arg8[%c0_5, %c0_6], %5 {strides = array<i32>} : memref<8x16xf32, #tpu.memory_space<vmem>>, vector<8x16xf32>,
    %c0_7 = arith.constant 0 : index
    %c0_8 = arith.constant 0 : index
    %7 = vector.load %arg4[%c0_7, %c0_8] : memref<32x16xf32, #tpu.memory_space<vmem>>, vector<32x16xf32>
    %cst_9 = arith.constant dense<0.000000e+00> : vector<8x16xf32>
    %8 = tpu.matmul %0, %7, %cst_9 {dimension_numbers = #tpu.dot_dimension_numbers<[1], [0], [0], [1], [0, 0, 1, 1], [], []>} : vector<8x32xf32>, vector<32x16xf32>, vector<8x16xf32> -> vector<8x16xf32>
    %c0_10 = arith.constant 0 : index
    %c0_11 = arith.constant 0 : index
    %9 = vector.load %arg5[%c0_10, %c0_11] : memref<1x16xf32, #tpu.memory_space<vmem>>, vector<1x16xf32>
    %10 = vector.broadcast %9 : vector<1x16xf32> to vector<8x16xf32>
    %11 = arith.addf %8, %10 : vector<8x16xf32>
    %12 = math.exp %11 : vector<8x16xf32>
    %c0_12 = arith.constant 0 : index
    %c0_13 = arith.constant 0 : index
    %13 = vector.load %arg9[%c0_12, %c0_13] : memref<8x16xf32, #tpu.memory_space<vmem>>, vector<8x16xf32>
    tpu.vector_store %arg9[%c0_12, %c0_13], %12 {strides = array<i32>} : memref<8x16xf32, #tpu.memory_space<vmem>>, vector<8x16xf32>,
    %c0_14 = arith.constant 0 : index
    %c0_15 = arith.constant 0 : index
    %14 = vector.load %arg6[%c0_14, %c0_15] : memref<32x2xf32, #tpu.memory_space<vmem>>, vector<32x2xf32>
    %cst_16 = arith.constant dense<0.000000e+00> : vector<8x2xf32>
    %15 = tpu.matmul %0, %14, %cst_16 {dimension_numbers = #tpu.dot_dimension_numbers<[1], [0], [0], [1], [0, 0, 1, 1], [], []>} : vector<8x32xf32>, vector<32x2xf32>, vector<8x2xf32> -> vector<8x2xf32>
    %c0_17 = arith.constant 0 : index
    %c0_18 = arith.constant 0 : index
    %16 = vector.load %arg7[%c0_17, %c0_18] : memref<1x2xf32, #tpu.memory_space<vmem>>, vector<1x2xf32>
    %17 = vector.broadcast %16 : vector<1x2xf32> to vector<8x2xf32>
    %18 = arith.addf %15, %17 : vector<8x2xf32>
    %cst_19 = arith.constant dense<0xFF800000> : vector<8xf32>
    %19 = vector.multi_reduction <maximumf>, %18, %cst_19 [1] : vector<8x2xf32> to vector<8xf32>
    %20 = vector.shape_cast %19 : vector<8xf32> to vector<8x1xf32>
    %21 = vector.broadcast %20 : vector<8x1xf32> to vector<8x2xf32>
    %22 = arith.subf %18, %21 : vector<8x2xf32>
    %23 = math.exp %22 : vector<8x2xf32>
    %cst_20 = arith.constant dense<0.000000e+00> : vector<8xf32>
    %24 = vector.multi_reduction <add>, %23, %cst_20 [1] : vector<8x2xf32> to vector<8xf32>
    %25 = vector.shape_cast %24 : vector<8xf32> to vector<8x1xf32>
    %26 = vector.broadcast %25 : vector<8x1xf32> to vector<8x2xf32>
    %27 = arith.divf %23, %26 : vector<8x2xf32>
    %c0_21 = arith.constant 0 : index
    %c0_22 = arith.constant 0 : index
    %28 = vector.load %arg10[%c0_21, %c0_22] : memref<8x2xf32, #tpu.memory_space<vmem>>, vector<8x2xf32>
    tpu.vector_store %arg10[%c0_21, %c0_22], %27 {strides = array<i32>} : memref<8x2xf32, #tpu.memory_space<vmem>>, vector<8x2xf32>,
    return
  }
  func.func @transform_0(%arg0: i32) -> (i32, i32) {
    %c0_i32 = arith.constant 0 : i32
    %c0_i32_0 = arith.constant 0 : i32
    return %arg0, %c0_i32 : i32, i32
  }
  func.func @transform_1(%arg0: i32) -> (i32, i32) {
    %c0_i32 = arith.constant 0 : i32
    %c0_i32_0 = arith.constant 0 : i32
    %c0_i32_1 = arith.constant 0 : i32
    return %c0_i32, %c0_i32_0 : i32, i32
  }
  func.func @transform_2(%arg0: i32) -> (i32, i32) {
    %c0_i32 = arith.constant 0 : i32
    %c0_i32_0 = arith.constant 0 : i32
    %c0_i32_1 = arith.constant 0 : i32
    return %c0_i32, %c0_i32_0 : i32, i32
  }
  func.func @transform_3(%arg0: i32) -> (i32, i32) {
    %c0_i32 = arith.constant 0 : i32
    %c0_i32_0 = arith.constant 0 : i32
    %c0_i32_1 = arith.constant 0 : i32
    return %c0_i32, %c0_i32_0 : i32, i32
  }
  func.func @transform_4(%arg0: i32) -> (i32, i32) {
    %c0_i32 = arith.constant 0 : i32
    %c0_i32_0 = arith.constant 0 : i32
    %c0_i32_1 = arith.constant 0 : i32
    return %c0_i32, %c0_i32_0 : i32, i32
  }
  func.func @transform_5(%arg0: i32) -> (i32, i32) {
    %c0_i32 = arith.constant 0 : i32
    %c0_i32_0 = arith.constant 0 : i32
    %c0_i32_1 = arith.constant 0 : i32
    return %c0_i32, %c0_i32_0 : i32, i32
  }
  func.func @transform_6(%arg0: i32) -> (i32, i32) {
    %c0_i32 = arith.constant 0 : i32
    %c0_i32_0 = arith.constant 0 : i32
    %c0_i32_1 = arith.constant 0 : i32
    return %c0_i32, %c0_i32_0 : i32, i32
  }
  func.func @transform_7(%arg0: i32) -> (i32, i32) {
    %c0_i32 = arith.constant 0 : i32
    %c0_i32_0 = arith.constant 0 : i32
    return %arg0, %c0_i32 : i32, i32
  }
  func.func @transform_8(%arg0: i32) -> (i32, i32) {
    %c0_i32 = arith.constant 0 : i32
    %c0_i32_0 = arith.constant 0 : i32
    return %arg0, %c0_i32 : i32, i32
  }
  func.func @transform_9(%arg0: i32) -> (i32, i32) {
    %c0_i32 = arith.constant 0 : i32
    %c0_i32_0 = arith.constant 0 : i32
    return %arg0, %c0_i32 : i32, i32
  }
}

</mosaic_0001>

<bundles_post_ra>
// kernel: tpu_custom_call.1
= control target key start
LH: loop header
LB: loop body
LE: loop exit
PB: predicated region body
PF: predicated region fallthrough
CT: control target
= control target key end

     0   :  { %15 = vsyncpa [#allocation3], 0  ;;  %v437_v1 = vmov 0.0   ;;  %vm438_vm0 = vmmov 0   ;;  %s559_s0 = inlined_call_operand.vmem [shape: f32[8,32], index: 0, kind: input, shape index: {}]   ;;  %s560_s1 = inlined_call_operand.vmem [shape: f32[32,16], index: 1, kind: input, shape index: {}]   ;;  %s561_s2 = inlined_call_operand.vmem [shape: f32[1,16], index: 2, kind: input, shape index: {}]   ;;  %s562_s3 = inlined_call_operand.vmem [shape: f32[32,16], index: 3, kind: input, shape index: {}]   ;;  %s563_s4 = inlined_call_operand.vmem [shape: f32[1,16], index: 4, kind: input, shape index: {}]   ;;  %s564_s5 = inlined_call_operand.vmem [shape: f32[32,2], index: 5, kind: input, shape index: {}]   ;;  %s565_s6 = inlined_call_operand.vmem [shape: f32[1,2], index: 6, kind: input, shape index: {}]   ;;  %s566_s7 = inlined_call_operand.hbm [shape: f32[8,16], index: 7, kind: output, shape index: {0}]   ;;  %s567_s8 = inlined_call_operand.hbm [shape: f32[8,16], index: 8, kind: output, shape index: {1}]   ;;  %s568_s9 = inlined_call_operand.vmem [shape: f32[8,2], index: 9, kind: output, shape index: {2}]  }
   0x1   :  { %v35_v0 = vld [vmem:[%s560_s1 + $0x18] sm:$0xff]  ;;  %350 = vmatprep.subr.mxu0 %v437_v1  ;;  %v34_v2 = vld [vmem:[%s560_s1 + $0x10] sm:$0xff]  ;;  %358 = vmatprep.mubr.msk.f32.mxu0 %vm438_vm0, %v437_v1  ;;  %v33_v3 = vld [vmem:[%s560_s1 + $0x8] sm:$0xff] }
   0x2   :  { %351 = vmatpush3.msra.mxu0 %v35_v0  ;;  %361 = vmatprep.subr.mxu1 %v437_v1 }
   0x3   :  { %352 = vmatprep.subr.mxu0 %v437_v1  ;;  %369 = vmatprep.mubr.msk.f32.mxu1 %vm438_vm0, %v437_v1 }
   0x4   :  { %16 = vsyncpa [#allocation5], 0  ;;  %353 = vmatpush3.msra.mxu0 %v34_v2  ;;  %v32_v4 = vld [vmem:[%s560_s1] sm:$0xff]  ;;  %vm43_vm1 = vcmask 261120   ;;  %v206_v6 = vld [vmem:[%s564_s5 + $0x18] sm:$0xff]  ;;  %vm117_vm2 = vcmask 130048  }
   0x5   :  { %354 = vmatprep.subr.mxu0 %v437_v1  ;;  %v31_v5 = vld [vmem:[%s559_s0] sm:$0xff]  ;;  %v205_v7 = vld [vmem:[%s564_s5 + $0x10] sm:$0xff]  ;;  %v204_v8 = vld [vmem:[%s564_s5 + $0x8] sm:$0xff]  ;;  %vm284_vm3 = vcmask 15360   ;;  %s440_s16 = smov [#allocation4]  }
   0x6   :  { %355 = vmatpush3.msra.mxu0 %v33_v3  ;;  %v203_v9 = vld [vmem:[%s564_s5] sm:$0xff]  ;;  %v122_v10 = vld [vmem:[%s562_s3 + $0x18] sm:$0xff]  ;;  %v121_v11 = vld [vmem:[%s562_s3 + $0x10] sm:$0xff] }
   0x7   :  { %356 = vmatprep.subr.mxu0 %v437_v1  ;;  %362 = vmatpush3.msra.mxu1 %v122_v10  ;;  %v120_v12 = vld [vmem:[%s562_s3 + $0x8] sm:$0xff]  ;;  %v119_v13 = vld [vmem:[%s562_s3] sm:$0xff] }
   0x8   :  { %357 = vmatpush3.msra.mxu0 %v32_v4  ;;  %363 = vmatprep.subr.mxu1 %v437_v1  ;;  %v329_v14 = vld [vmem:[%s561_s2] ss:$0 sm:$0xff]  ;;  %s439_s2 = smov [#allocation2]  }
   0x9   :  { %359 = vmatmul.mubr.msk.f32.vlgmr.msra.gmra.mxu0 %vm43_vm1, %v31_v5  ;;  %372 = vmatprep.subr.mxu0 %v437_v1  ;;  %v333_v18 = vld [vmem:[%s565_s6] ss:$0 sm:$0xff]  ;;  %s303_s6 = sshll.u32 %s439_s2, 4  ;;  %s304_s6 = int_to_ptr.vmem [resolvable:$true] %s303_s6 }
   0xa   :  { %373 = vmatpush3.msra.mxu0 %v206_v6  ;;  %380 = vmatprep.mubr.msk.f32.mxu0 %vm438_vm0, %v437_v1  ;;  %v331_v23 = vld [vmem:[%s563_s4] ss:$0 sm:$0xff]  ;;  %s313_s4 = sshll.u32 %s440_s16, 4  ;;  %s393_s17 = scalar_lea.vmem %s304_s6, 128  ;;  %s314_s4 = int_to_ptr.vmem [resolvable:$true] %s313_s4 }
   0xb   :  { %374 = vmatprep.subr.mxu0 %v437_v1  ;;  %364 = vmatpush3.msra.mxu1 %v121_v11  ;;  %p394_p0 = scmp.ne.s32.totalorder %s304_s6, %s393_s17  ;;  %p398_p1 = scmp.lt.s32.totalorder %s304_s6, %s304_s6 }
   0xc   :  { %375 = vmatpush3.msra.mxu0 %v205_v7  ;;  %365 = vmatprep.subr.mxu1 %v437_v1  ;;  %p399_p2 = scmp.lt.s32.totalorder %s393_s17, %s393_s17 }
   0xd   :  { %376 = vmatprep.subr.mxu0 %v437_v1  ;;  %366 = vmatpush3.msra.mxu1 %v120_v12 }
   0xe   :  { %377 = vmatpush3.msra.mxu0 %v204_v8  ;;  %367 = vmatprep.subr.mxu1 %v437_v1  ;;  %p400_p3 = por %p399_p2, %p398_p1 }
   0xf   :  { %378 = vmatprep.subr.mxu0 %v437_v1  ;;  %368 = vmatpush3.msra.mxu1 %v119_v13 }
  0x10   :  { %379 = vmatpush3.msra.mxu0 %v203_v9  ;;  %370 = vmatmul.mubr.msk.f32.vlgmr.msra.gmra.mxu1 %vm43_vm1, %v31_v5  ;;  %p401_p4 = pnand %p400_p3, %p394_p0 }
  0x11   :  { %381 = vmatmul.mubr.msk.f32.vlgmr.msra.gmra.mxu0 %vm43_vm1, %v31_v5 }
  0xc9   :  { %v113_v15 = vpop.f32.mrf.mxu0 }
  0xca   :  { %v114_v16 = vadd.f32 %v329_v14, %v113_v15 }
  0xcb   :  { %v360_v17 = vpop.f32.mrf.mxu0 }
  0xcc   :  { %118 = vst.msk [vmem:[#allocation2] sm:$0xff] %vm117_vm2, %v114_v16 }
  0xd0   :  { %v196_v24 = vpop.f32.mrf.mxu1 }
  0xd1   :  { %v280_v19 = vpop.f32.mrf.mxu0  ;;  %v197_v25 = vadd.f32 %v331_v23, %v196_v24 }
  0xd2   :  { %v281_v20 = vadd.f32 %v333_v18, %v280_v19  ;;  %v371_v26 = vpop.f32.mrf.mxu1 }
  0xd3   :  { %v382_v21 = vpop.f32.mrf.mxu0  ;;  %v200_v27 = vmul.f32 1.442695, %v197_v25 }
  0xd4   :  { %v285_v22 = vsel %vm284_vm3, %v281_v20, -inf }
  0xd5   :  { %286 = vmax.xlane.f32.xlu0 %v285_v22  ;;  %387 = vpow2.f32 %v200_v27 }
  0xe2   :  { %v388_v28 = vpop.eup %387 }
  0xe3   :  { %202 = vst.msk [vmem:[#allocation4] sm:$0xff] %vm117_vm2, %v388_v28 }
 0x15e   :  { %v287_v29 = vpop.xlane.xlu0 %286 }
 0x15f   :  { %v288_v30 = vsub.f32 %v281_v20, %v287_v29 }
 0x161   :  { %v289_v31 = vmul.f32 1.442695, %v288_v30 }
 0x163   :  { %389 = vpow2.f32 %v289_v31 }
 0x170   :  { %v390_v32 = vpop.eup %389 }
 0x171   :  { %v291_v33 = vsel %vm284_vm3, %v390_v32, 0.0 }
 0x172   :  { %292 = vadd.xlane.f32.xlu0 %v291_v33 }
 0x173   :  { %404 = shalt.err (!%p401_p4)
}
 0x174   :  { %306 = dma.vmem_to_hbm [thread:$0]  %s304_s6, 128, %s566_s7, [#allocation3]  }
 0x175   :  { %s413_s20 = scalar_lea.vmem %s314_s4, 128  ;;  %p418_p6 = scmp.lt.s32.totalorder %s314_s4, %s314_s4 }
 0x176   :  { %p414_p5 = scmp.ne.s32.totalorder %s314_s4, %s413_s20  ;;  %p419_p7 = scmp.lt.s32.totalorder %s413_s20, %s413_s20 }
 0x178   :  { %p420_p8 = por %p419_p7, %p418_p6 }
 0x17a   :  { %p421_p9 = pnand %p420_p8, %p414_p5 }
 0x17c   :  { %424 = shalt.err (!%p421_p9)
}
 0x17d   :  { %316 = dma.vmem_to_hbm [thread:$0]  %s314_s4, 128, %s567_s8, [#allocation5]  }
 0x1fb   :  { %v293_v34 = vpop.xlane.xlu0 %292 }
 0x1fc   :  { %391 = vrcp.f32 %v293_v34 }
 0x209   :  { %v392_v35 = vpop.eup %391 }
 0x20a   :  { %v295_v36 = vmul.f32 %v392_v35, %v390_v32 }
 0x20c   :  { %296 = vst.msk [vmem:[%s568_s9] sm:$0xff] %vm284_vm3, %v295_v36 }
 0x20d   :  { %433 = dma.done.wait [#allocation3], 128  }
 0x20e   :  { %434 = vsyncadd [#allocation3], 4294967168 }
 0x20f   :  { %435 = dma.done.wait [#allocation5], 128  }
 0x210   :  { %436 = vsyncadd [#allocation5], 4294967168 }
 0x211   :  { %327 = vsyncpa [#allocation3], 1 }
 0x212   :  { %328 = vsyncpa [#allocation5], 1 }

</bundles_post_ra>
